<compile_context>
chip_gen: v6e
topology: v6e:2x2x1
jax: 0.10.0
libtpu: 0.0.40
codegen_flags: <defaults>
</compile_context>

<pallas_src>
import math

import jax
import jax.numpy as jnp
from jax.experimental import pallas as pl
from jax.experimental.pallas import tpu as pltpu

_C_PAD = 128  # lane-dense logits slab (class_num padded to 128 lanes)


def _longformer_head_kernel(
    qk_ref,     # (bt, D)     bf16  scaled global query  (Wk @ Wq @ cls / sqrt(D))
    emb_ref,    # (bt, TS, D) bf16  token-embedding tile (the dominant HBM stream)
    mask_ref,   # (bt, TS)    f32   attention-mask tile (1 = keep)
    wv_ref,     # (D, D) f32   value projection
    wp_ref,     # (D, D) f32   pooler weight
    bp_ref,     # (1, D) f32   pooler bias
    w1_ref,     # (D, H) f32   classifier[0] weight
    b1_ref,     # (1, H) f32   classifier[0] bias
    w2_ref,     # (H, C_PAD) f32  classifier[2] weight (lane-padded)
    b2_ref,     # (1, C_PAD) f32  classifier[2] bias   (lane-padded)
    out_ref,    # (bt, C_PAD) f32  logits slab
    m_ref,      # scratch (bt, 1) f32 : running max
    l_ref,      # scratch (bt, 1) f32 : running denom
    acc_ref,    # scratch (bt, D) f32 : running sum_s p_s * emb_s
):
    s_idx = pl.program_id(1)
    bt, ts, d = emb_ref.shape

    # --- first sequence tile of this batch block: reset accumulators --------
    @pl.when(s_idx == 0)
    def _init():
        m_ref[...] = jnp.full_like(m_ref, -jnp.inf)
        l_ref[...] = jnp.zeros_like(l_ref)
        acc_ref[...] = jnp.zeros_like(acc_ref)

    # --- streamed online-softmax over this sequence tile ---------------------
    emb_b = emb_ref[...]                                        # (bt, ts, d) bf16
    qk3 = qk_ref[...].reshape(bt, 1, d)                         # (bt, 1, d) bf16
    scores = jnp.einsum(
        'bqd,bkd->bqk', qk3, emb_b,
        preferred_element_type=jnp.float32).reshape(bt, ts)     # (bt, ts) f32
    # finite sentinel (not -inf) keeps alpha NaN-free even on fully-masked tiles
    scores = jnp.where(mask_ref[...] > 0.0, scores, jnp.float32(-1e9))

    m_prev = m_ref[...]                                         # (bt, 1)
    m_new = jnp.maximum(m_prev, jnp.max(scores, axis=-1, keepdims=True))
    alpha = jnp.exp(m_prev - m_new)
    p = jnp.exp(scores - m_new)                                 # (bt, ts) f32
    l_ref[...] = alpha * l_ref[...] + jnp.sum(p, axis=-1, keepdims=True)
    pv = jnp.einsum(
        'bqk,bkd->bqd', p.astype(jnp.bfloat16).reshape(bt, 1, ts), emb_b,
        preferred_element_type=jnp.float32).reshape(bt, d)      # (bt, d) f32
    acc_ref[...] = alpha * acc_ref[...] + pv
    m_ref[...] = m_new

    # --- last tile: value projection, pooler, classifier ---------------------
    @pl.when(s_idx == pl.num_programs(1) - 1)
    def _finalize():
        inv_l = pl.reciprocal(l_ref[...], approx=False)         # once per sequence
        wctx = acc_ref[...] * inv_l                             # (bt, d) f32
        ctx = jnp.dot(wctx, wv_ref[...], preferred_element_type=jnp.float32)
        pooled = jnp.tanh(
            jnp.dot(ctx, wp_ref[...], preferred_element_type=jnp.float32)
            + bp_ref[...])
        # dropout == identity in eval mode
        h = jnp.dot(pooled, w1_ref[...], preferred_element_type=jnp.float32) + b1_ref[...]
        h = jnp.maximum(h, 0.0)
        logits = jnp.dot(h, w2_ref[...], preferred_element_type=jnp.float32) + b2_ref[...]
        out_ref[...] = logits.astype(out_ref.dtype)


def longformer_classifier(X, masks, params, *, seq_tile=1024, batch_tile=None):
    """X: (B, S) int32 token ids, masks: (B, S). Returns (B, class_num) f32 logits."""
    B, S = X.shape
    D = params["wq"].shape[0]
    H = params["w1"].shape[1]
    C = params["w2"].shape[1]

    # --- embedding gather directly in bf16: one HBM pass over (B,S,D) --------
    emb_table_bf16 = params.get("emb_table_bf16")
    if emb_table_bf16 is None:
        emb_table_bf16 = params["emb_table"].astype(jnp.bfloat16)
    emb_b = jnp.take(emb_table_bf16, X, axis=0)                  # (B, S, D) bf16

    # Global token always attends (global_attention_mask[:, 0] = 1 semantics).
    masks = masks.astype(jnp.float32).at[:, 0].set(1.0)

    # --- one-shot scaled query, hoisted out of the kernel (tiny B*D^2) -------
    cls = jnp.take(params["emb_table"], X[:, 0], axis=0)         # (B, D) f32, exact
    q = jnp.dot(cls, params["wq"], preferred_element_type=jnp.float32)
    qk = jax.lax.dot_general(                                    # q @ Wk.T
        q, params["wk"],
        dimension_numbers=(((1,), (1,)), ((), ())),
        preferred_element_type=jnp.float32)
    qk_b = (qk * (1.0 / math.sqrt(D))).astype(jnp.bfloat16)      # (B, D) bf16

    # Lane-dense classifier output: pad class_num -> 128 lanes.
    w2p = jnp.zeros((H, _C_PAD), jnp.float32).at[:, :C].set(params["w2"])
    b2p = jnp.zeros((1, _C_PAD), jnp.float32).at[:, :C].set(params["b2"])

    # --- tiling ---------------------------------------------------------------
    ts = S if S <= seq_tile else seq_tile
    assert S % ts == 0, "seq_len must be divisible by the sequence tile"
    assert ts == S or ts % 128 == 0, "tiled seq blocks must be lane-aligned"
    bt = batch_tile if batch_tile is not None else min(B, 8)
    assert B % bt == 0, "batch must be divisible by the batch tile"
    assert bt == B or bt % 8 == 0, "batch tile must be sublane-aligned when tiling"
    grid = (B // bt, S // ts)

    # VMEM budget: double-buffered emb/mask tiles + single-buffered weights +
    # scratch.  Clamp to a v7x-safe scoped limit (64 MiB physical there); on
    # v5e/v6e this could be raised toward their 128 MiB for even bigger tiles.
    emb_tile_bytes = 2 * (bt * ts * D * 2)
    mask_tile_bytes = 2 * (bt * ts * 4)
    weight_bytes = 4 * (2 * D * D + D + D * H + H + H * _C_PAD + _C_PAD)
    misc_bytes = 2 * bt * (D * 2 + _C_PAD * 4) + 4 * bt * (D + 2) + (1 << 20)
    vmem_limit = int(min(
        max(2 * (emb_tile_bytes + mask_tile_bytes + weight_bytes + misc_bytes),
            32 * 1024 * 1024),
        56 * 1024 * 1024))

    const = lambda b, s: (0, 0)
    # Constant weights: fetched once, single-buffered (no wasted double buffer).
    wspec = lambda shape: pl.BlockSpec(shape, const, pipeline_mode=pl.Buffered(1))

    out = pl.pallas_call(
        _longformer_head_kernel,
        out_shape=jax.ShapeDtypeStruct((B, _C_PAD), jnp.float32),
        grid_spec=pltpu.PrefetchScalarGridSpec(
            num_scalar_prefetch=0,
            grid=grid,
            in_specs=[
                pl.BlockSpec((bt, D), lambda b, s: (b, 0)),        # scaled query
                pl.BlockSpec((bt, ts, D), lambda b, s: (b, s, 0)),  # emb stream
                pl.BlockSpec((bt, ts), lambda b, s: (b, s)),        # mask stream
                wspec((D, D)),          # wv
                wspec((D, D)),          # wp
                wspec((1, D)),          # bp
                wspec((D, H)),          # w1
                wspec((1, H)),          # b1
                wspec((H, _C_PAD)),     # w2 (padded)
                wspec((1, _C_PAD)),     # b2 (padded)
            ],
            out_specs=pl.BlockSpec((bt, _C_PAD), lambda b, s: (b, 0)),
            scratch_shapes=[
                pltpu.VMEM((bt, 1), jnp.float32),   # running max
                pltpu.VMEM((bt, 1), jnp.float32),   # running denom
                pltpu.VMEM((bt, D), jnp.float32),   # weighted-emb accumulator
            ],
        ),
        compiler_params=pltpu.CompilerParams(
            dimension_semantics=("parallel", "arbitrary"),
            vmem_limit_bytes=vmem_limit,
        ),
    )(qk_b, emb_b, masks, params["wv"], params["wp"], params["bp"],
      params["w1"], params["b1"], w2p, b2p)
    return out[:, :C]


# --------------------------- reference & init --------------------------------

def _reference(X, masks, params):
    """Pure-JAX f32 reference of the same functional stand-in."""
    emb = jnp.take(params["emb_table"], X, axis=0)
    B, S, D = emb.shape
    masks = masks.astype(jnp.float32).at[:, 0].set(1.0)
    cls = emb[:, 0, :]
    q = cls @ params["wq"]
    k = jnp.einsum('bsd,de->bse', emb, params["wk"])
    v = jnp.einsum('bsd,de->bse', emb, params["wv"])
    scores = jnp.einsum('bd,bsd->bs', q, k) / jnp.sqrt(jnp.float32(D))
    scores = jnp.where(masks > 0.0, scores, -1e9)
    p = jax.nn.softmax(scores, axis=-1)
    ctx = jnp.einsum('bs,bsd->bd', p, v)
    pooled = jnp.tanh(ctx @ params["wp"] + params["bp"])
    h = jnp.maximum(pooled @ params["w1"] + params["b1"], 0.0)
    return h @ params["w2"] + params["b2"]


def _xavier_uniform(key, shape):
    fan_in, fan_out = shape
    limit = jnp.sqrt(6.0 / (fan_in + fan_out))
    return jax.random.uniform(key, shape, jnp.float32, -limit, limit)


def init_params(key, vocab, D, H, C):
    ks = jax.random.split(key, 8)
    emb_table = jax.random.normal(ks[0], (vocab, D), jnp.float32) * 0.02
    return {
        "emb_table": emb_table,
        "emb_table_bf16": emb_table.astype(jnp.bfloat16),   # cast once, reused
        "wq": jax.random.normal(ks[1], (D, D), jnp.float32) * 0.02,
        "wk": jax.random.normal(ks[2], (D, D), jnp.float32) * 0.02,
        "wv": jax.random.normal(ks[3], (D, D), jnp.float32) * 0.02,
        "wp": jax.random.normal(ks[4], (D, D), jnp.float32) * 0.02,
        "bp": jnp.zeros((1, D), jnp.float32),
        # classifier: xavier_uniform weights, zero biases (matches init_weight)
        "w1": _xavier_uniform(ks[5], (D, H)),
        "b1": jnp.zeros((1, H), jnp.float32),
        "w2": _xavier_uniform(ks[6], (H, C)),
        "b2": jnp.zeros((1, C), jnp.float32),
    }


if __name__ == "__main__":
    # Small shapes consistent with the module's forward.
    B, S = 2, 8                 # batch, seq_len (from masks.size())
    D = 32                      # opt.embedding_dim
    H = 16                      # opt.hidden_size
    C = 4                       # opt.class_num
    VOCAB = 100

    key = jax.random.PRNGKey(0)
    k_param, k_tok, k_tok2, k_mask = jax.random.split(key, 4)
    params = init_params(k_param, VOCAB, D, H, C)

    # --- config 1: toy shapes, single sequence tile, full batch block --------
    X = jax.random.randint(k_tok, (B, S), 0, VOCAB, dtype=jnp.int32)
    masks = jnp.ones((B, S), jnp.float32)

    out = jax.block_until_ready(longformer_classifier(X, masks, params))
    assert out.shape == (B, C) and out.dtype == jnp.float32
    ref = _reference(X, masks, params)
    tol = 1e-4 + 0.05 * float(jnp.max(jnp.abs(ref)))
    assert float(jnp.max(jnp.abs(out - ref))) < tol, "mismatch on single-tile path"

    # --- config 2: multi-tile streaming + multi-block parallel batch axis ----
    B2, S2 = 16, 256
    X2 = jax.random.randint(k_tok2, (B2, S2), 0, VOCAB, dtype=jnp.int32)
    masks2 = (jax.random.uniform(k_mask, (B2, S2)) > 0.3).astype(jnp.float32)
    out2 = jax.block_until_ready(
        longformer_classifier(X2, masks2, params, seq_tile=128, batch_tile=8))
    ref2 = _reference(X2, masks2, params)
    tol2 = 1e-4 + 0.05 * float(jnp.max(jnp.abs(ref2)))
    assert out2.shape == (B2, C)
    assert float(jnp.max(jnp.abs(out2 - ref2))) < tol2, "mismatch on multi-tile path"

    print("KERNEL_OK")
</pallas_src>

<mosaic_0001>
module attributes {stable_mosaic.version = 11 : i64} {
  func.func @_longformer_head_kernel(%arg0: i32, %arg1: i32, %arg2: memref<2x32xbf16, #tpu.memory_space<vmem>>, %arg3: memref<2x8x32xbf16, #tpu.memory_space<vmem>>, %arg4: memref<2x8xf32, #tpu.memory_space<vmem>>, %arg5: memref<32x32xf32, #tpu.memory_space<vmem>>, %arg6: memref<32x32xf32, #tpu.memory_space<vmem>>, %arg7: memref<1x32xf32, #tpu.memory_space<vmem>>, %arg8: memref<32x16xf32, #tpu.memory_space<vmem>>, %arg9: memref<1x16xf32, #tpu.memory_space<vmem>>, %arg10: memref<16x128xf32, #tpu.memory_space<vmem>>, %arg11: memref<1x128xf32, #tpu.memory_space<vmem>>, %arg12: memref<2x128xf32, #tpu.memory_space<vmem>>, %arg13: memref<2x1xf32, #tpu.memory_space<vmem>>, %arg14: memref<2x1xf32, #tpu.memory_space<vmem>>, %arg15: memref<2x32xf32, #tpu.memory_space<vmem>>) attributes {dimension_semantics = [#tpu.dimension_semantics<parallel>, #tpu.dimension_semantics<arbitrary>], iteration_bounds = array<i64: 1, 1>, scalar_prefetch = 0 : i64, scratch_operands = 3 : i64, tpu.core_type = #tpu.core_type<tc>, window_params = [{transform_indices = @transform_0, window_bounds = array<i64: 2, 32>}, {transform_indices = @transform_1, window_bounds = array<i64: 2, 8, 32>}, {transform_indices = @transform_2, window_bounds = array<i64: 2, 8>}, {pipeline_mode = #tpu.pipeline_mode<synchronous>, transform_indices = @transform_3, window_bounds = array<i64: 32, 32>}, {pipeline_mode = #tpu.pipeline_mode<synchronous>, transform_indices = @transform_4, window_bounds = array<i64: 32, 32>}, {pipeline_mode = #tpu.pipeline_mode<synchronous>, transform_indices = @transform_5, window_bounds = array<i64: 1, 32>}, {pipeline_mode = #tpu.pipeline_mode<synchronous>, transform_indices = @transform_6, window_bounds = array<i64: 32, 16>}, {pipeline_mode = #tpu.pipeline_mode<synchronous>, transform_indices = @transform_7, window_bounds = array<i64: 1, 16>}, {pipeline_mode = #tpu.pipeline_mode<synchronous>, transform_indices = @transform_8, window_bounds = array<i64: 16, 128>}, {pipeline_mode = #tpu.pipeline_mode<synchronous>, transform_indices = @transform_9, window_bounds = array<i64: 1, 128>}, {transform_indices = @transform_10, window_bounds = array<i64: 2, 128>}]} {
    %c0_i32 = arith.constant 0 : i32
    %0 = arith.cmpi eq, %arg1, %c0_i32 : i32
    %1 = arith.extui %0 : i1 to i32
    %c0_i32_0 = arith.constant 0 : i32
    %2 = arith.cmpi ne, %1, %c0_i32_0 : i32
    scf.if %2 {
      %cst_26 = arith.constant 0xFF800000 : f32
      %41 = vector.broadcast %cst_26 : f32 to vector<2x1xf32>
      %c0_27 = arith.constant 0 : index
      %c0_28 = arith.constant 0 : index
      %42 = vector.load %arg13[%c0_27, %c0_28] : memref<2x1xf32, #tpu.memory_space<vmem>>, vector<2x1xf32>
      tpu.vector_store %arg13[%c0_27, %c0_28], %41 {strides = array<i32>} : memref<2x1xf32, #tpu.memory_space<vmem>>, vector<2x1xf32>,
      %cst_29 = arith.constant 0.000000e+00 : f32
      %43 = vector.broadcast %cst_29 : f32 to vector<2x1xf32>
      %c0_30 = arith.constant 0 : index
      %c0_31 = arith.constant 0 : index
      %44 = vector.load %arg14[%c0_30, %c0_31] : memref<2x1xf32, #tpu.memory_space<vmem>>, vector<2x1xf32>
      tpu.vector_store %arg14[%c0_30, %c0_31], %43 {strides = array<i32>} : memref<2x1xf32, #tpu.memory_space<vmem>>, vector<2x1xf32>,
      %cst_32 = arith.constant 0.000000e+00 : f32
      %45 = vector.broadcast %cst_32 : f32 to vector<2x32xf32>
      %c0_33 = arith.constant 0 : index
      %c0_34 = arith.constant 0 : index
      %46 = vector.load %arg15[%c0_33, %c0_34] : memref<2x32xf32, #tpu.memory_space<vmem>>, vector<2x32xf32>
      tpu.vector_store %arg15[%c0_33, %c0_34], %45 {strides = array<i32>} : memref<2x32xf32, #tpu.memory_space<vmem>>, vector<2x32xf32>,
    } else {
    }
    %c0 = arith.constant 0 : index
    %c0_1 = arith.constant 0 : index
    %c0_2 = arith.constant 0 : index
    %3 = vector.load %arg3[%c0, %c0_1, %c0_2] : memref<2x8x32xbf16, #tpu.memory_space<vmem>>, vector<2x8x32xbf16>
    %c0_3 = arith.constant 0 : index
    %c0_4 = arith.constant 0 : index
    %4 = vector.load %arg2[%c0_3, %c0_4] : memref<2x32xbf16, #tpu.memory_space<vmem>>, vector<2x32xbf16>
    %5 = vector.shape_cast %4 : vector<2x32xbf16> to vector<2x1x32xbf16>
    "tpu.trace_start"() <{level = 10 : i32, message = "bqd,bkd->bqk"}> : () -> ()
    %cst = arith.constant dense<0.000000e+00> : vector<2x1x8xf32>
    %6 = tpu.matmul %5, %3, %cst {dimension_numbers = #tpu.dot_dimension_numbers<[2], [2], [1], [1], [0, 0, 0, 1, 1, 1], [0], [0]>} : vector<2x1x32xbf16>, vector<2x8x32xbf16>, vector<2x1x8xf32> -> vector<2x1x8xf32>
    "tpu.trace_stop"() : () -> ()
    %7 = vector.shape_cast %6 : vector<2x1x8xf32> to vector<2x8xf32>
    %c0_5 = arith.constant 0 : index
    %c0_6 = arith.constant 0 : index
    %8 = vector.load %arg4[%c0_5, %c0_6] : memref<2x8xf32, #tpu.memory_space<vmem>>, vector<2x8xf32>
    %cst_7 = arith.constant 0.000000e+00 : f32
    %9 = vector.broadcast %cst_7 : f32 to vector<2x8xf32>
    %10 = arith.cmpf ogt, %8, %9 : vector<2x8xf32>
    %cst_8 = arith.constant -1.000000e+09 : f32
    %11 = vector.broadcast %cst_8 : f32 to vector<2x8xf32>
    %12 = arith.select %10, %7, %11 : vector<2x8xi1>, vector<2x8xf32>
    %c0_9 = arith.constant 0 : index
    %c0_10 = arith.constant 0 : index
    %13 = vector.load %arg13[%c0_9, %c0_10] : memref<2x1xf32, #tpu.memory_space<vmem>>, vector<2x1xf32>
    %cst_11 = arith.constant dense<0xFF800000> : vector<2xf32>
    %14 = vector.multi_reduction <maximumf>, %12, %cst_11 [1] : vector<2x8xf32> to vector<2xf32>
    %15 = vector.shape_cast %14 : vector<2xf32> to vector<2x1xf32>
    %16 = arith.maximumf %13, %15 : vector<2x1xf32>
    %17 = arith.subf %13, %16 : vector<2x1xf32>
    %18 = math.exp %17 : vector<2x1xf32>
    %19 = vector.broadcast %16 : vector<2x1xf32> to vector<2x8xf32>
    %20 = arith.subf %12, %19 : vector<2x8xf32>
    %21 = math.exp %20 : vector<2x8xf32>
    %c0_12 = arith.constant 0 : index
    %c0_13 = arith.constant 0 : index
    %22 = vector.load %arg14[%c0_12, %c0_13] : memref<2x1xf32, #tpu.memory_space<vmem>>, vector<2x1xf32>
    %23 = arith.mulf %18, %22 : vector<2x1xf32>
    %cst_14 = arith.constant dense<0.000000e+00> : vector<2xf32>
    %24 = vector.multi_reduction <add>, %21, %cst_14 [1] : vector<2x8xf32> to vector<2xf32>
    %25 = vector.shape_cast %24 : vector<2xf32> to vector<2x1xf32>
    %26 = arith.addf %23, %25 : vector<2x1xf32>
    %c0_15 = arith.constant 0 : index
    %c0_16 = arith.constant 0 : index
    %27 = vector.load %arg14[%c0_15, %c0_16] : memref<2x1xf32, #tpu.memory_space<vmem>>, vector<2x1xf32>
    tpu.vector_store %arg14[%c0_15, %c0_16], %26 {strides = array<i32>} : memref<2x1xf32, #tpu.memory_space<vmem>>, vector<2x1xf32>,
    %28 = arith.truncf %21 : vector<2x8xf32> to vector<2x8xbf16>
    %29 = vector.shape_cast %28 : vector<2x8xbf16> to vector<2x1x8xbf16>
    "tpu.trace_start"() <{level = 10 : i32, message = "bqk,bkd->bqd"}> : () -> ()
    %cst_17 = arith.constant dense<0.000000e+00> : vector<2x1x32xf32>
    %30 = tpu.matmul %29, %3, %cst_17 {dimension_numbers = #tpu.dot_dimension_numbers<[2], [1], [1], [2], [0, 0, 0, 1, 1, 2], [0], [0]>} : vector<2x1x8xbf16>, vector<2x8x32xbf16>, vector<2x1x32xf32> -> vector<2x1x32xf32>
    "tpu.trace_stop"() : () -> ()
    %31 = vector.shape_cast %30 : vector<2x1x32xf32> to vector<2x32xf32>
    %c0_18 = arith.constant 0 : index
    %c0_19 = arith.constant 0 : index
    %32 = vector.load %arg15[%c0_18, %c0_19] : memref<2x32xf32, #tpu.memory_space<vmem>>, vector<2x32xf32>
    %33 = vector.broadcast %18 : vector<2x1xf32> to vector<2x32xf32>
    %34 = arith.mulf %33, %32 : vector<2x32xf32>
    %35 = arith.addf %34, %31 : vector<2x32xf32>
    %c0_20 = arith.constant 0 : index
    %c0_21 = arith.constant 0 : index
    %36 = vector.load %arg15[%c0_20, %c0_21] : memref<2x32xf32, #tpu.memory_space<vmem>>, vector<2x32xf32>
    tpu.vector_store %arg15[%c0_20, %c0_21], %35 {strides = array<i32>} : memref<2x32xf32, #tpu.memory_space<vmem>>, vector<2x32xf32>,
    %c0_22 = arith.constant 0 : index
    %c0_23 = arith.constant 0 : index
    %37 = vector.load %arg13[%c0_22, %c0_23] : memref<2x1xf32, #tpu.memory_space<vmem>>, vector<2x1xf32>
    tpu.vector_store %arg13[%c0_22, %c0_23], %16 {strides = array<i32>} : memref<2x1xf32, #tpu.memory_space<vmem>>, vector<2x1xf32>,
    %c0_i32_24 = arith.constant 0 : i32
    %38 = arith.cmpi eq, %arg1, %c0_i32_24 : i32
    %39 = arith.extui %38 : i1 to i32
    %c0_i32_25 = arith.constant 0 : i32
    %40 = arith.cmpi ne, %39, %c0_i32_25 : i32
    scf.if %40 {
      %c0_26 = arith.constant 0 : index
      %c0_27 = arith.constant 0 : index
      %41 = vector.load %arg14[%c0_26, %c0_27] : memref<2x1xf32, #tpu.memory_space<vmem>>, vector<2x1xf32>
      %42 = tpu.reciprocal %41 : vector<2x1xf32> -> vector<2x1xf32>
      %c0_28 = arith.constant 0 : index
      %c0_29 = arith.constant 0 : index
      %43 = vector.load %arg15[%c0_28, %c0_29] : memref<2x32xf32, #tpu.memory_space<vmem>>, vector<2x32xf32>
      %44 = vector.broadcast %42 : vector<2x1xf32> to vector<2x32xf32>
      %45 = arith.mulf %43, %44 : vector<2x32xf32>
      %c0_30 = arith.constant 0 : index
      %c0_31 = arith.constant 0 : index
      %46 = vector.load %arg5[%c0_30, %c0_31] : memref<32x32xf32, #tpu.memory_space<vmem>>, vector<32x32xf32>
      %cst_32 = arith.constant dense<0.000000e+00> : vector<2x32xf32>
      %47 = tpu.matmul %45, %46, %cst_32 {dimension_numbers = #tpu.dot_dimension_numbers<[1], [0], [0], [1], [0, 0, 1, 1], [], []>} : vector<2x32xf32>, vector<32x32xf32>, vector<2x32xf32> -> vector<2x32xf32>
      %c0_33 = arith.constant 0 : index
      %c0_34 = arith.constant 0 : index
      %48 = vector.load %arg6[%c0_33, %c0_34] : memref<32x32xf32, #tpu.memory_space<vmem>>, vector<32x32xf32>
      %cst_35 = arith.constant dense<0.000000e+00> : vector<2x32xf32>
      %49 = tpu.matmul %47, %48, %cst_35 {dimension_numbers = #tpu.dot_dimension_numbers<[1], [0], [0], [1], [0, 0, 1, 1], [], []>} : vector<2x32xf32>, vector<32x32xf32>, vector<2x32xf32> -> vector<2x32xf32>
      %c0_36 = arith.constant 0 : index
      %c0_37 = arith.constant 0 : index
      %50 = vector.load %arg7[%c0_36, %c0_37] : memref<1x32xf32, #tpu.memory_space<vmem>>, vector<1x32xf32>
      %51 = vector.broadcast %50 : vector<1x32xf32> to vector<2x32xf32>
      %52 = arith.addf %49, %51 : vector<2x32xf32>
      %53 = math.tanh %52 : vector<2x32xf32>
      %c0_38 = arith.constant 0 : index
      %c0_39 = arith.constant 0 : index
      %54 = vector.load %arg8[%c0_38, %c0_39] : memref<32x16xf32, #tpu.memory_space<vmem>>, vector<32x16xf32>
      %cst_40 = arith.constant dense<0.000000e+00> : vector<2x16xf32>
      %55 = tpu.matmul %53, %54, %cst_40 {dimension_numbers = #tpu.dot_dimension_numbers<[1], [0], [0], [1], [0, 0, 1, 1], [], []>} : vector<2x32xf32>, vector<32x16xf32>, vector<2x16xf32> -> vector<2x16xf32>
      %c0_41 = arith.constant 0 : index
      %c0_42 = arith.constant 0 : index
      %56 = vector.load %arg9[%c0_41, %c0_42] : memref<1x16xf32, #tpu.memory_space<vmem>>, vector<1x16xf32>
      %57 = vector.broadcast %56 : vector<1x16xf32> to vector<2x16xf32>
      %58 = arith.addf %55, %57 : vector<2x16xf32>
      %cst_43 = arith.constant 0.000000e+00 : f32
      %59 = vector.broadcast %cst_43 : f32 to vector<2x16xf32>
      %60 = arith.maximumf %58, %59 : vector<2x16xf32>
      %c0_44 = arith.constant 0 : index
      %c0_45 = arith.constant 0 : index
      %61 = vector.load %arg10[%c0_44, %c0_45] : memref<16x128xf32, #tpu.memory_space<vmem>>, vector<16x128xf32>
      %cst_46 = arith.constant dense<0.000000e+00> : vector<2x128xf32>
      %62 = tpu.matmul %60, %61, %cst_46 {dimension_numbers = #tpu.dot_dimension_numbers<[1], [0], [0], [1], [0, 0, 1, 1], [], []>} : vector<2x16xf32>, vector<16x128xf32>, vector<2x128xf32> -> vector<2x128xf32>
      %c0_47 = arith.constant 0 : index
      %c0_48 = arith.constant 0 : index
      %63 = vector.load %arg11[%c0_47, %c0_48] : memref<1x128xf32, #tpu.memory_space<vmem>>, vector<1x128xf32>
      %64 = vector.broadcast %63 : vector<1x128xf32> to vector<2x128xf32>
      %65 = arith.addf %62, %64 : vector<2x128xf32>
      %c0_49 = arith.constant 0 : index
      %c0_50 = arith.constant 0 : index
      %66 = vector.load %arg12[%c0_49, %c0_50] : memref<2x128xf32, #tpu.memory_space<vmem>>, vector<2x128xf32>
      tpu.vector_store %arg12[%c0_49, %c0_50], %65 {strides = array<i32>} : memref<2x128xf32, #tpu.memory_space<vmem>>, vector<2x128xf32>,
    } else {
    }
    return
  }
  func.func @transform_0(%arg0: i32, %arg1: i32) -> (i32, i32) {
    %c0_i32 = arith.constant 0 : i32
    %c0_i32_0 = arith.constant 0 : i32
    return %arg0, %c0_i32 : i32, i32
  }
  func.func @transform_1(%arg0: i32, %arg1: i32) -> (i32, i32, i32) {
    %c0_i32 = arith.constant 0 : i32
    %c0_i32_0 = arith.constant 0 : i32
    return %arg0, %arg1, %c0_i32 : i32, i32, i32
  }
  func.func @transform_2(%arg0: i32, %arg1: i32) -> (i32, i32) {
    %c0_i32 = arith.constant 0 : i32
    return %arg0, %arg1 : i32, i32
  }
  func.func @transform_3(%arg0: i32, %arg1: i32) -> (i32, i32) {
    %c0_i32 = arith.constant 0 : i32
    %c0_i32_0 = arith.constant 0 : i32
    %c0_i32_1 = arith.constant 0 : i32
    return %c0_i32, %c0_i32_0 : i32, i32
  }
  func.func @transform_4(%arg0: i32, %arg1: i32) -> (i32, i32) {
    %c0_i32 = arith.constant 0 : i32
    %c0_i32_0 = arith.constant 0 : i32
    %c0_i32_1 = arith.constant 0 : i32
    return %c0_i32, %c0_i32_0 : i32, i32
  }
  func.func @transform_5(%arg0: i32, %arg1: i32) -> (i32, i32) {
    %c0_i32 = arith.constant 0 : i32
    %c0_i32_0 = arith.constant 0 : i32
    %c0_i32_1 = arith.constant 0 : i32
    return %c0_i32, %c0_i32_0 : i32, i32
  }
  func.func @transform_6(%arg0: i32, %arg1: i32) -> (i32, i32) {
    %c0_i32 = arith.constant 0 : i32
    %c0_i32_0 = arith.constant 0 : i32
    %c0_i32_1 = arith.constant 0 : i32
    return %c0_i32, %c0_i32_0 : i32, i32
  }
  func.func @transform_7(%arg0: i32, %arg1: i32) -> (i32, i32) {
    %c0_i32 = arith.constant 0 : i32
    %c0_i32_0 = arith.constant 0 : i32
    %c0_i32_1 = arith.constant 0 : i32
    return %c0_i32, %c0_i32_0 : i32, i32
  }
  func.func @transform_8(%arg0: i32, %arg1: i32) -> (i32, i32) {
    %c0_i32 = arith.constant 0 : i32
    %c0_i32_0 = arith.constant 0 : i32
    %c0_i32_1 = arith.constant 0 : i32
    return %c0_i32, %c0_i32_0 : i32, i32
  }
  func.func @transform_9(%arg0: i32, %arg1: i32) -> (i32, i32) {
    %c0_i32 = arith.constant 0 : i32
    %c0_i32_0 = arith.constant 0 : i32
    %c0_i32_1 = arith.constant 0 : i32
    return %c0_i32, %c0_i32_0 : i32, i32
  }
  func.func @transform_10(%arg0: i32, %arg1: i32) -> (i32, i32) {
    %c0_i32 = arith.constant 0 : i32
    %c0_i32_0 = arith.constant 0 : i32
    return %arg0, %c0_i32 : i32, i32
  }
}

</mosaic_0001>

<bundles_post_ra>
// kernel: tpu_custom_call.1
= control target key start
LH: loop header
LB: loop body
LE: loop exit
PB: predicated region body
PF: predicated region fallthrough
CT: control target
= control target key end

     0   :  { %15 = vsyncpa [#allocation6], 0  ;;  %s1087_s0 = inlined_call_operand.vmem [shape: bf16[2,32], index: 0, kind: input, shape index: {}]   ;;  %s1088_s1 = inlined_call_operand.hbm [shape: bf16[2,8,32], index: 1, kind: input, shape index: {}]   ;;  %s1089_s2 = inlined_call_operand.vmem [shape: f32[2,8], index: 2, kind: input, shape index: {}]   ;;  %s1090_s3 = inlined_call_operand.vmem [shape: f32[32,32], index: 3, kind: input, shape index: {}]   ;;  %s1091_s4 = inlined_call_operand.hbm [shape: f32[32,32], index: 4, kind: input, shape index: {}]   ;;  %s1092_s5 = inlined_call_operand.vmem [shape: f32[1,32], index: 5, kind: input, shape index: {}]   ;;  %s1093_s6 = inlined_call_operand.vmem [shape: f32[32,16], index: 6, kind: input, shape index: {}]   ;;  %s1094_s7 = inlined_call_operand.vmem [shape: f32[1,16], index: 7, kind: input, shape index: {}]   ;;  %s1095_s8 = inlined_call_operand.vmem [shape: f32[16,128], index: 8, kind: input, shape index: {}]   ;;  %s1096_s9 = inlined_call_operand.vmem [shape: f32[1,128], index: 9, kind: input, shape index: {}]   ;;  %s1097_s10 = inlined_call_operand.hbm [shape: f32[2,128], index: 10, kind: output, shape index: {}]  }
   0x1   :  { %16 = vsyncpa [#allocation9], 0 }
   0x2   :  { %17 = vsyncpa [#allocation7], 0  ;;  %s903_s13 = smov [#allocation5]  }
   0x3   :  { %s25_s14 = sshll.u32 %s903_s13, 4  ;;  %s26_s14 = int_to_ptr.vmem [resolvable:$true] %s25_s14 }
   0x4   :  { %s845_s15 = scalar_lea.vmem %s26_s14, 128  ;;  %p850_p1 = scmp.lt.s32.totalorder %s26_s14, %s26_s14 }
   0x5   :  { %p846_p0 = scmp.ne.s32.totalorder %s26_s14, %s845_s15  ;;  %p851_p2 = scmp.lt.s32.totalorder %s845_s15, %s845_s15 }
   0x7   :  { %p852_p3 = por %p851_p2, %p850_p1 }
   0x9   :  { %p853_p4 = pnand %p852_p3, %p846_p0 }
   0xb   :  { %856 = shalt.err (!%p853_p4)
}
   0xc   :  { %s904_s16 = smov 64   ;;  %s905_s17 = smov 4  }
   0xd   :  { %31 = dma.hbm_to_vmem [thread:$0]  %s1088_s1, 128, %s26_s14, [#allocation6], %s904_s16, %s904_s16, %s905_s17  }
   0xe   :  { %s906_s20 = smov [#allocation8]  }
   0xf   :  { %s41_s21 = sshll.u32 %s906_s20, 4  ;;  %s42_s21 = int_to_ptr.vmem [resolvable:$true] %s41_s21 }
  0x10   :  { %s865_s22 = scalar_lea.vmem %s42_s21, 512  ;;  %p870_p6 = scmp.lt.s32.totalorder %s42_s21, %s42_s21 }
  0x11   :  { %p866_p5 = scmp.ne.s32.totalorder %s42_s21, %s865_s22  ;;  %p871_p7 = scmp.lt.s32.totalorder %s865_s22, %s865_s22 }
  0x13   :  { %p872_p8 = por %p871_p7, %p870_p6 }
  0x15   :  { %p873_p9 = pnand %p872_p8, %p866_p5 }
  0x17   :  { %876 = shalt.err (!%p873_p9)
}
  0x18   :  { %s907_s23 = smov 128   ;;  %s908_s24 = smov 8  }
  0x19   :  { %47 = dma.hbm_to_vmem [thread:$0]  %s1091_s4, 512, %s42_s21, [#allocation9], %s907_s23, %s907_s23, %s908_s24  }
  0x1a   :  { %897 = dma.done.wait [#allocation6], 128  }
  0x1b   :  { %898 = vsyncadd [#allocation6], 4294967168 }
  0x1c   :  { %899 = dma.done.wait [#allocation9], 512  }
  0x1d   :  { %900 = vsyncadd [#allocation9], 4294966784  ;;  %v909_v0 = vmov 0.0   ;;  %v81_v1 = vlaneseq  ;;  %vm910_vm0 = vmmov 0   ;;  %vm85_vm1 = vcmask 261120   ;;  %v368_v54 = vld [vmem:[%s1090_s3 + $0x18] sm:$0xff] }
  0x1e   :  { %751 = vmatprep.subr.bf16.mxu0 %v909_v0  ;;  %757 = vmatprep.subr.bf16.mxu1 %v909_v0  ;;  %v74_v3 = vld [vmem:[#allocation5] sm:$0xf]  ;;  %v75_v4 = vld [vmem:[#allocation5 + $0x4] sm:$0xf]  ;;  %v76_v5 = vld [vmem:[%s1087_s0] sm:$0x1] }
  0x1f   :  { %753 = vmatprep.mubr.msk.bf16.mxu0 %vm910_vm0, %v909_v0  ;;  %759 = vmatprep.mubr.msk.bf16.mxu1 %vm910_vm0, %v909_v0  ;;  %v982_v2 = vshrl.u32 %v81_v1, 7  ;;  %v90_v6 = vsel %vm85_vm1, %v74_v3, 0  ;;  %v141_v7 = vsel %vm85_vm1, %v75_v4, 0  ;;  %v712_v9 = vpack.i.b16 %v76_v5, %v76_v5  ;;  %v183_v17 = vld [vmem:[%s1089_s2] sm:$0x3]  ;;  %v367_v55 = vld [vmem:[%s1090_s3 + $0x10] sm:$0xff] }
  0x20   :  { %752 = vmatpush3.bf16.xpose.msra.mxu0 %v90_v6  ;;  %758 = vmatpush3.bf16.xpose.msra.mxu1 %v141_v7  ;;  %v79_v10 = vunpack.i.h.s16 %v76_v5  ;;  %vm244_vm2 = vcmask 1043456   ;;  %vm69_vm3 = vcmask 1024   ;;  %v911_v16 = vmov -inf   ;;  %v366_v56 = vld [vmem:[%s1090_s3 + $0x8] sm:$0xff]  ;;  %v365_v62 = vld [vmem:[%s1090_s3] sm:$0xff]  ;;  %s914_s27 = smov [#allocation10]  }
  0x21   :  { %v990_v8 = vsub.s32 0, %v982_v2  ;;  %763 = vmatprep.subr.bf16.mxu0 %v909_v0  ;;  %769 = vmatprep.subr.bf16.mxu1 %v909_v0  ;;  %v245_v14 = vsel %vm244_vm2, %v74_v3, 0  ;;  %v295_v15 = vsel %vm244_vm2, %v75_v4, 0  ;;  %70 = vst.msk [vmem:[#allocation2] sm:$0x3] %vm69_vm3, %v911_v16  ;;  %vm188_vm4 = vcmask 1041409  }
  0x22   :  { %v132_v11 = vpack.i.b16 %v79_v10, %v79_v10  ;;  %71 = vst.msk [vmem:[#allocation3] sm:$0x3] %vm69_vm3, %v909_v0  ;;  %vm184_vm5 = vcmp.gt.f32.partialorder %v183_v17, 0.0  ;;  %vm193_vm6 = vcmask 58368   ;;  %v912_v30 = vmov 0   ;;  %v445_v63 = vld [vmem:[#allocation8 + $0x18] sm:$0xff] }
  0x23   :  { %v84_v12 = vrot.slane %v712_v9, %v990_v8  ;;  %827 = vset.pattern.permute.xlu0 %v912_v30  ;;  %828 = vset.pattern.permute.xlu1 %v912_v30  ;;  %v913_v38 = vmov 1966171168   ;;  %vm72_vm7 = vcmask 254976   ;;  %vm240_vm8 = vcmask 64512   ;;  %v444_v1 = vld [vmem:[#allocation8 + $0x10] sm:$0xff]  ;;  %v443_v3 = vld [vmem:[#allocation8 + $0x8] sm:$0xff] }
  0x24   :  { %v136_v13 = vrot.slane %v132_v11, %v990_v8  ;;  %v220_v39 = vunpack.c.l.s4 %v913_v38  ;;  %73 = vst.msk [vmem:[#allocation4] sm:$0x3] %vm72_vm7, %v909_v0  ;;  %v442_v4 = vld [vmem:[#allocation8] sm:$0xff]  ;;  %vm621_vm9 = vcmask 130048   ;;  %s702_s2 = sshll.u32 %s914_s27, 4  ;;  %s703_s2 = int_to_ptr.vmem [resolvable:$true] %s702_s2 }
  0x25   :  { %p882_p11 = scmp.lt.s32.totalorder %s703_s2, %s703_s2 }
  0x26   :  { %v221_v40 = vunpack.c.0.s8 %v220_v39 }
  0x27   :  { %754 = vmatmul.mubr.msk.bf16.vlgmr.msra.gmra.mxu0 %vm85_vm1, %v84_v12  ;;  %760 = vmatmul.mubr.msk.bf16.vlgmr.msra.gmra.mxu1 %vm85_vm1, %v136_v13 }
  0x28   :  { %764 = vmatpush3.bf16.msra.mxu0 %v245_v14  ;;  %765 = vmatprep.mubr.msk.bf16.mxu0 %vm910_vm0, %v909_v0  ;;  %v192_v31 = vld [vmem:[#allocation2] sm:$0x3]  ;;  %v224_v41 = vsub.s32 %v221_v40, %v982_v2 }
  0x29   :  { %770 = vmatpush3.bf16.msra.mxu1 %v295_v15  ;;  %771 = vmatprep.mubr.msk.bf16.mxu1 %vm910_vm0, %v909_v0  ;;  %v209_v57 = vld [vmem:[#allocation3] sm:$0x3]  ;;  %v723_v40 = vld [vmem:[%s1096_s9] ss:$0 sm:$0xff] }
  0x2a   :  { %775 = vmatprep.subr.mxu0 %v909_v0  ;;  %786 = vmatprep.subr.mxu1 %v909_v0 }
  0x2b   :  { %v337_v6 = vld [vmem:[#allocation4] sm:$0x3] }
  0xe7   :  { %v126_v18 = vpop.f32.mrf.mxu0  ;;  %v177_v19 = vpop.f32.mrf.mxu1 }
  0xe8   :  { %v187_v20 = vrot.slane %v177_v19, 7 }
  0xe9   :  { %v755_v21 = vpop.f32.mrf.mxu0  ;;  %v761_v22 = vpop.f32.mrf.mxu1 }
  0xea   :  { %v189_v23 = vsel %vm188_vm4, %v187_v20, %v126_v18 }
  0xeb   :  { %v129_v24 = vpop.f32.mrf.mxu0  ;;  %v180_v25 = vpop.f32.mrf.mxu1  ;;  %v191_v26 = vsel %vm184_vm5, %v189_v23, -1e+09 }
  0xec   :  { %v194_v27 = vsel %vm193_vm6, %v191_v26, -inf  ;;  %v530_v24 = vld [vmem:[%s1093_s6 + $0x18] sm:$0xff]  ;;  %v529_v25 = vld [vmem:[%s1093_s6 + $0x10] sm:$0xff] }
  0xed   :  { %v762_v28 = vpop.f32.mrf.mxu1  ;;  %195 = vmax.xlane.f32.xlu0 %v194_v27  ;;  %v756_v29 = vpop.f32.mrf.mxu0  ;;  %v527_v27 = vld [vmem:[%s1093_s6] sm:$0xff] }
  0xee   :  { %v719_v28 = vld [vmem:[%s1092_s5] ss:$0 sm:$0xff] }
 0x176   :  { %v196_v32 = vpop.xlane.xlu0 %195 }
 0x177   :  { %v197_v33 = vmax.f32 %v192_v31, %v196_v32 }
 0x179   :  { %v198_v34 = vsub.f32 %v192_v31, %v197_v33  ;;  %352 = vst.msk [vmem:[#allocation2] sm:$0x3] %vm69_vm3, %v197_v33  ;;  %203 = vperm.xlu0 %827, %v197_v33   ;;  %v613_v33 = vld [vmem:[%s1095_s8 + $0x8] sm:$0xff] }
 0x17b   :  { %v199_v43 = vmul.f32 1.442695, %v198_v34  ;;  %v612_v34 = vld [vmem:[%s1095_s8] sm:$0xff]  ;;  %s877_s8 = scalar_lea.vmem %s703_s2, 32 }
 0x17c   :  { %p878_p10 = scmp.ne.s32.totalorder %s703_s2, %s877_s8  ;;  %p883_p12 = scmp.lt.s32.totalorder %s877_s8, %s877_s8 }
 0x17e   :  { %p884_p13 = por %p883_p12, %p882_p11 }
 0x180   :  { %p885_p0 = pnand %p884_p13, %p878_p10 }
 0x1f4   :  { %v204_v35 = vpop.permute.xlu0 %203 }
 0x1f5   :  { %v206_v36 = vsub.f32 %v191_v26, %v204_v35  ;;  %v528_v26 = vld [vmem:[%s1093_s6 + $0x8] sm:$0xff]  ;;  %v721_v35 = vld [vmem:[%s1094_s7] ss:$0 sm:$0xff] }
 0x1f7   :  { %v207_v37 = vmul.f32 1.442695, %v206_v36 }
 0x1f9   :  { %829 = vpow2.f32 %v207_v37 }
 0x1fa   :  { %831 = vpow2.f32 %v199_v43 }
 0x206   :  { %v830_v42 = vpop.eup %829 }
 0x207   :  { %v217_v44 = vpack.c.bf16 %v830_v42, %v830_v42  ;;  %v211_v45 = vsel %vm193_vm6, %v830_v42, 0.0  ;;  %v832_v53 = vpop.eup %831 }
 0x208   :  { %212 = vadd.xlane.f32.xlu1 %v211_v45  ;;  %v210_v58 = vmul.f32 %v832_v53, %v209_v57 }
 0x209   :  { %v225_v46 = vrot.slane %v217_v44, %v224_v41 }
 0x20b   :  { %v232_v47 = vrot.slane %v225_v46, %v224_v41 }
 0x20d   :  { %v715_v48 = vpack.i.b16 %v232_v47, %v232_v47  ;;  %v234_v49 = vunpack.i.h.s16 %v232_v47 }
 0x20f   :  { %v239_v50 = vrot.slane %v715_v48, %v990_v8  ;;  %v287_v51 = vpack.i.b16 %v234_v49, %v234_v49 }
 0x211   :  { %766 = vmatmul.mubr.msk.bf16.vlgmr.msra.gmra.mxu0 %vm240_vm8, %v239_v50  ;;  %v291_v52 = vrot.slane %v287_v51, %v990_v8 }
 0x212   :  { %783 = vmatprep.mubr.msk.f32.mxu0 %vm910_vm0, %v909_v0  ;;  %776 = vmatpush3.msra.mxu0 %v368_v54 }
 0x213   :  { %772 = vmatmul.mubr.msk.bf16.vlgmr.msra.gmra.mxu1 %vm240_vm8, %v291_v52  ;;  %777 = vmatprep.subr.mxu0 %v909_v0 }
 0x214   :  { %794 = vmatprep.mubr.msk.f32.mxu1 %vm910_vm0, %v909_v0  ;;  %778 = vmatpush3.msra.mxu0 %v367_v55 }
 0x215   :  { %779 = vmatprep.subr.mxu0 %v909_v0  ;;  %787 = vmatpush3.msra.mxu1 %v445_v63 }
 0x216   :  { %780 = vmatpush3.msra.mxu0 %v366_v56  ;;  %788 = vmatprep.subr.mxu1 %v909_v0 }
 0x217   :  { %781 = vmatprep.subr.mxu0 %v909_v0  ;;  %789 = vmatpush3.msra.mxu1 %v444_v1 }
 0x218   :  { %782 = vmatpush3.msra.mxu0 %v365_v62  ;;  %790 = vmatprep.subr.mxu1 %v909_v0 }
 0x219   :  { %340 = vperm.xlu1 %828, %v832_v53   ;;  %797 = vmatprep.subr.mxu0 %v909_v0 }
 0x21a   :  { %791 = vmatpush3.msra.mxu1 %v443_v3 }
 0x21b   :  { %792 = vmatprep.subr.mxu1 %v909_v0 }
 0x21c   :  { %793 = vmatpush3.msra.mxu1 %v442_v4 }
 0x21d   :  { %808 = vmatprep.subr.mxu1 %v909_v0 }
 0x291   :  { %v213_v59 = vpop.xlane.xlu1 %212 }
 0x292   :  { %v214_v60 = vadd.f32 %v213_v59, %v210_v58 }
 0x294   :  { %216 = vst.msk [vmem:[#allocation3] sm:$0x3] %vm69_vm3, %v214_v60 }
 0x295   :  { %v341_v7 = vpop.permute.xlu1 %340 }
 0x296   :  { %v343_v11 = vmul.f32 %v341_v7, %v337_v6 }
 0x29b   :  { %v356_v61 = vld [vmem:[#allocation3] sm:$0x3] }
 0x29c   :  { %833 = vrcp.f32 %v356_v61 }
 0x2a9   :  { %v834_v2 = vpop.eup %833 }
 0x2aa   :  { %361 = vperm.xlu1 %828, %v834_v2  }
 0x2d1   :  { %v281_v5 = vpop.f32.mrf.mxu0 }
 0x2d3   :  { %v767_v8 = vpop.f32.mrf.mxu0  ;;  %v331_v9 = vpop.f32.mrf.mxu1 }
 0x2d4   :  { %v346_v10 = vrot.slane %v331_v9, 7 }
 0x2d5   :  { %v284_v12 = vpop.f32.mrf.mxu0  ;;  %v773_v13 = vpop.f32.mrf.mxu1 }
 0x2d6   :  { %v347_v14 = vsel %vm188_vm4, %v346_v10, %v281_v5 }
 0x2d7   :  { %v349_v15 = vadd.f32 %v347_v14, %v343_v11  ;;  %v768_v16 = vpop.f32.mrf.mxu0  ;;  %v334_v17 = vpop.f32.mrf.mxu1 }
 0x2d9   :  { %351 = vst.msk [vmem:[#allocation4] sm:$0x3] %vm72_vm7, %v349_v15  ;;  %v774_v18 = vpop.f32.mrf.mxu1 }
 0x2e0   :  { %v358_v19 = vld [vmem:[#allocation4] sm:$0x3] }
 0x325   :  { %v362_v20 = vpop.permute.xlu1 %361 }
 0x326   :  { %v364_v21 = vmul.f32 %v362_v20, %v358_v19 }
 0x328   :  { %784 = vmatmul.mubr.msk.f32.vlgmr.msra.gmra.mxu0 %vm85_vm1, %v364_v21 }
 0x329   :  { %805 = vmatprep.mubr.msk.f32.mxu0 %vm910_vm0, %v909_v0  ;;  %798 = vmatpush3.msra.mxu0 %v530_v24 }
 0x32a   :  { %799 = vmatprep.subr.mxu0 %v909_v0 }
 0x32b   :  { %800 = vmatpush3.msra.mxu0 %v529_v25 }
 0x32c   :  { %801 = vmatprep.subr.mxu0 %v909_v0 }
 0x32d   :  { %802 = vmatpush3.msra.mxu0 %v528_v26 }
 0x32e   :  { %803 = vmatprep.subr.mxu0 %v909_v0 }
 0x32f   :  { %804 = vmatpush3.msra.mxu0 %v527_v27 }
 0x3e8   :  { %v438_v22 = vpop.f32.mrf.mxu0 }
 0x3e9   :  { %795 = vmatmul.mubr.msk.f32.vlgmr.msra.gmra.mxu1 %vm85_vm1, %v438_v22 }
 0x3ea   :  { %v785_v23 = vpop.f32.mrf.mxu0  ;;  %812 = vmatprep.mubr.msk.f32.mxu1 %vm910_vm0, %v909_v0  ;;  %809 = vmatpush3.msra.mxu1 %v613_v33 }
 0x3eb   :  { %810 = vmatprep.subr.mxu1 %v909_v0 }
 0x3ec   :  { %811 = vmatpush3.msra.mxu1 %v612_v34 }
 0x4a9   :  { %v522_v29 = vpop.f32.mrf.mxu1 }
 0x4aa   :  { %v523_v30 = vadd.f32 %v719_v28, %v522_v29 }
 0x4ab   :  { %v796_v31 = vpop.f32.mrf.mxu1 }
 0x4ac   :  { %835 = vtanh.f32 %v523_v30 }
 0x4b9   :  { %v836_v32 = vpop.eup %835 }
 0x4ba   :  { %806 = vmatmul.mubr.msk.f32.vlgmr.msra.gmra.mxu0 %vm85_vm1, %v836_v32 }
 0x57a   :  { %v607_v36 = vpop.f32.mrf.mxu0 }
 0x57b   :  { %v608_v37 = vadd.f32 %v721_v35, %v607_v36 }
 0x57c   :  { %v807_v38 = vpop.f32.mrf.mxu0 }
 0x57d   :  { %v611_v39 = vmax.f32 %v608_v37, 0.0 }
 0x57f   :  { %813 = vmatmul.mubr.msk.f32.vlgmr.msra.gmra.mxu1 %vm621_vm9, %v611_v39 }
 0x63f   :  { %v691_v0 = vpop.f32.mrf.mxu1 }
 0x640   :  { %v692_v41 = vadd.f32 %v723_v40, %v691_v0 }
 0x641   :  { %v814_v42 = vpop.f32.mrf.mxu1 }
 0x642   :  { %695 = vst [vmem:[#allocation10] sm:$0x3] %v692_v41 }
 0x643   :  { %888 = shalt.err (!%p885_p0)
}
 0x644   :  { %705 = dma.vmem_to_hbm [thread:$0]  %s703_s2, 32, %s1097_s10, [#allocation7]  }
 0x645   :  { %901 = dma.done.wait [#allocation7], 32  }
 0x646   :  { %902 = vsyncadd [#allocation7], 4294967264 }
 0x647   :  { %709 = vsyncpa [#allocation6], 1 }
 0x648   :  { %710 = vsyncpa [#allocation9], 1 }
 0x649   :  { %711 = vsyncpa [#allocation7], 1 }

</bundles_post_ra>
